<compile_context>
chip_gen: v7x
topology: tpu7x:2x2x1
jax: 0.10.0
libtpu: 0.0.40
codegen_flags: <defaults>
</compile_context>

<pallas_src>
import functools

import jax
import jax.numpy as jnp
from jax.experimental import pallas as pl
from jax.experimental.pallas import tpu as pltpu


def _round_up(x, m):
    return (x + m - 1) // m * m


def _choose_tile_b(batch, hidden, x_dtype):
    """~8 MiB of x per pipeline buffer, multiple of 8 rows, capped at batch."""
    bytes_per_row = hidden * jnp.dtype(x_dtype).itemsize
    tile = (8 * 1024 * 1024) // max(1, bytes_per_row)
    tile = max(8, (tile // 8) * 8)
    return min(tile, _round_up(batch, 8))


def _dimension_semantics(core_parallel):
    """PARALLEL by default; CORE_PARALLEL on v7x so both TCs stream tiles."""
    if core_parallel is None:
        core_parallel = False
        try:
            kind = jax.devices()[0].device_kind.lower().replace(" ", "")
            core_parallel = ("v7" in kind) or ("tpu7" in kind)
        except Exception:
            pass
    return (pltpu.CORE_PARALLEL if core_parallel else pltpu.PARALLEL,)


def _bce_train_kernel(x_ref, w_ref, b_ref, y_ref, partial_ref, *,
                      tile_b, batch, need_mask):
    # Linear for this batch tile: (TILE_B, H) @ (H, 4) + (1, 4), f32 accumulate.
    z = jnp.dot(x_ref[...], w_ref[...], preferred_element_type=jnp.float32)
    z = z + b_ref[...].astype(jnp.float32)

    # PyTorch-faithful BCE: explicit f32 sigmoid, then log terms clamped at -100
    # (BCELoss semantics). sigmoid saturates to exactly 0/1 for large |z| just
    # like torch, so the -100 clamp engages identically.
    p = 1.0 / (1.0 + jnp.exp(-z))
    log_p = jnp.maximum(jnp.log(p), -100.0)
    log_1mp = jnp.maximum(jnp.log(1.0 - p), -100.0)

    y = y_ref[...].astype(jnp.float32)
    per_elem = -(y * log_p + (1.0 - y) * log_1mp)

    if need_mask:
        # Ragged last block: rows >= batch are out-of-bounds reads (garbage,
        # possibly NaN/Inf). Select (not multiply) so they cannot propagate.
        rows = (pl.program_id(0) * tile_b
                + jax.lax.broadcasted_iota(jnp.int32, per_elem.shape, 0))
        per_elem = jnp.where(rows < batch, per_elem, 0.0)

    tile_sum = jnp.sum(per_elem)
    # One lane/sublane-aligned (8,128) block per tile; wrapper reads [i, 0, 0]
    # and finishes the global mean (divide by B*4).
    partial_ref[...] = jnp.broadcast_to(tile_sum, partial_ref.shape).astype(jnp.float32)


def _predict_kernel(x_ref, w_ref, b_ref, pred_ref):
    z = jnp.dot(x_ref[...], w_ref[...], preferred_element_type=jnp.float32)
    z = z + b_ref[...].astype(jnp.float32)
    pred_ref[...] = (1.0 / (1.0 + jnp.exp(-z))).astype(pred_ref.dtype)


def classify_model_forward(tensors, labels, weight_t, bias, mode="train",
                           tile_b=None, core_parallel=None):
    """Classify_Model.forward.

    tensors:  (B, H) features (f32 or bf16; matmul accumulates in f32)
    labels:   (B, 4) targets
    weight_t: (H, 4) Classify_layer weight, pre-transposed (PyTorch weight.T)
    bias:     (1, 4)
    mode:     'train' -> scalar mean BCE loss; else -> sigmoid predictions (B, 4)
    """
    B, H = tensors.shape
    out_dim = weight_t.shape[1]
    if tile_b is None:
        tile_b = _choose_tile_b(B, H, tensors.dtype)
    tile_b = max(8, (tile_b // 8) * 8)
    num_tiles = -(-B // tile_b)           # ceil-div; last block may be ragged
    ragged = (num_tiles * tile_b) != B

    x_spec = pl.BlockSpec((tile_b, H), lambda i: (i, 0))
    w_spec = pl.BlockSpec((H, out_dim), lambda i: (0, 0))   # resident across tiles
    b_spec = pl.BlockSpec((1, out_dim), lambda i: (0, 0))   # resident across tiles
    cparams = pltpu.CompilerParams(
        dimension_semantics=_dimension_semantics(core_parallel),
        vmem_limit_bytes=32 * 1024 * 1024,
    )

    if mode == "train":
        y = labels.astype(jnp.float32)
        kernel = functools.partial(_bce_train_kernel, tile_b=tile_b, batch=B,
                                   need_mask=ragged)
        partials = pl.pallas_call(
            kernel,
            out_shape=jax.ShapeDtypeStruct((num_tiles, 8, 128), jnp.float32),
            grid_spec=pl.GridSpec(
                grid=(num_tiles,),
                in_specs=[x_spec, w_spec, b_spec,
                          pl.BlockSpec((tile_b, out_dim), lambda i: (i, 0))],
                out_specs=pl.BlockSpec((1, 8, 128), lambda i: (i, 0, 0)),
            ),
            compiler_params=cparams,
        )(tensors, weight_t, bias, y)
        # Global mean: divide by B * 4 (not the per-tile count).
        return jnp.sum(partials[:, 0, 0]) / jnp.float32(B * out_dim)

    # Eval: out-of-bounds writes of the ragged last block are dropped by Pallas,
    # so the output is exactly (B, 4) with no padding / slicing traffic.
    pred = pl.pallas_call(
        _predict_kernel,
        out_shape=jax.ShapeDtypeStruct((B, out_dim), jnp.float32),
        grid_spec=pl.GridSpec(
            grid=(num_tiles,),
            in_specs=[x_spec, w_spec, b_spec],
            out_specs=pl.BlockSpec((tile_b, out_dim), lambda i: (i, 0)),
        ),
        compiler_params=cparams,
    )(tensors, weight_t, bias)
    return pred


if __name__ == "__main__":
    key = jax.random.PRNGKey(0)
    k_x, k_y, k_w, k_b = jax.random.split(key, 4)

    # Small shapes consistent with 'last_layer' feature mode.
    B, H = 8, 32                               # batch, bert_hidden_size

    tensors = jax.random.normal(k_x, (B, H), dtype=jnp.float32)
    labels = (jax.random.uniform(k_y, (B, 4)) > 0.5).astype(jnp.float32)

    # PyTorch Linear default init: U(-1/sqrt(H), 1/sqrt(H)), weight shape (out, in)
    bound = 1.0 / jnp.sqrt(jnp.float32(H))
    weight = jax.random.uniform(k_w, (4, H), minval=-bound, maxval=bound,
                                dtype=jnp.float32)
    bias = jax.random.uniform(k_b, (4,), minval=-bound, maxval=bound,
                              dtype=jnp.float32)

    weight_t = weight.T                        # (H, 4) for x @ W^T
    bias_2d = bias.reshape(1, 4)

    # Pure-JAX reference (PyTorch semantics: sigmoid + BCELoss with -100 log clamp)
    def ref_forward(x, y, mode):
        p = jax.nn.sigmoid(x @ weight_t + bias_2d)
        if mode == "train":
            return jnp.mean(-(y * jnp.maximum(jnp.log(p), -100.0)
                              + (1.0 - y) * jnp.maximum(jnp.log(1.0 - p), -100.0)))
        return p

    # Kernel runs (tile-aligned batch)
    loss = classify_model_forward(tensors, labels, weight_t, bias_2d, mode="train")
    jax.block_until_ready(loss)
    predict = classify_model_forward(tensors, labels, weight_t, bias_2d, mode="eval")
    jax.block_until_ready(predict)
    assert jnp.allclose(loss, ref_forward(tensors, labels, "train"),
                        atol=1e-5, rtol=1e-5), (loss, ref_forward(tensors, labels, "train"))
    assert jnp.allclose(predict, ref_forward(tensors, labels, "eval"),
                        atol=1e-5, rtol=1e-5)

    # Ragged batch (B not a multiple of tile_b): exercises masked last block.
    B2 = 10
    x2 = jax.random.normal(jax.random.PRNGKey(1), (B2, H), dtype=jnp.float32)
    y2 = (jax.random.uniform(jax.random.PRNGKey(2), (B2, 4)) > 0.5).astype(jnp.float32)
    loss2 = classify_model_forward(x2, y2, weight_t, bias_2d, mode="train", tile_b=8)
    pred2 = classify_model_forward(x2, y2, weight_t, bias_2d, mode="eval", tile_b=8)
    jax.block_until_ready((loss2, pred2))
    assert jnp.allclose(loss2, ref_forward(x2, y2, "train"), atol=1e-5, rtol=1e-5), (
        loss2, ref_forward(x2, y2, "train"))
    assert jnp.allclose(pred2, ref_forward(x2, y2, "eval"), atol=1e-5, rtol=1e-5)

    print("KERNEL_OK")
</pallas_src>

<mosaic_0001>
module attributes {stable_mosaic.version = 11 : i64} {
  func.func @_bce_train_kernel(%arg0: i32, %arg1: memref<8x32xf32, #tpu.memory_space<vmem>>, %arg2: memref<32x4xf32, #tpu.memory_space<vmem>>, %arg3: memref<1x4xf32, #tpu.memory_space<vmem>>, %arg4: memref<8x4xf32, #tpu.memory_space<vmem>>, %arg5: memref<1x8x128xf32, #tpu.memory_space<vmem>>) attributes {dimension_semantics = [#tpu.dimension_semantics<parallel>], iteration_bounds = array<i64: 1>, scalar_prefetch = 0 : i64, scratch_operands = 0 : i64, tpu.core_type = #tpu.core_type<tc>, window_params = [{transform_indices = @transform_0, window_bounds = array<i64: 8, 32>}, {pipeline_mode = #tpu.pipeline_mode<synchronous>, transform_indices = @transform_1, window_bounds = array<i64: 32, 4>}, {pipeline_mode = #tpu.pipeline_mode<synchronous>, transform_indices = @transform_2, window_bounds = array<i64: 1, 4>}, {transform_indices = @transform_3, window_bounds = array<i64: 8, 4>}, {transform_indices = @transform_4, window_bounds = array<i64: 1, 8, 128>}]} {
    %c0 = arith.constant 0 : index
    %c0_0 = arith.constant 0 : index
    %0 = vector.load %arg1[%c0, %c0_0] : memref<8x32xf32, #tpu.memory_space<vmem>>, vector<8x32xf32>
    %c0_1 = arith.constant 0 : index
    %c0_2 = arith.constant 0 : index
    %1 = vector.load %arg2[%c0_1, %c0_2] : memref<32x4xf32, #tpu.memory_space<vmem>>, vector<32x4xf32>
    %cst = arith.constant dense<0.000000e+00> : vector<8x4xf32>
    %2 = tpu.matmul %0, %1, %cst {dimension_numbers = #tpu.dot_dimension_numbers<[1], [0], [0], [1], [0, 0, 1, 1], [], []>} : vector<8x32xf32>, vector<32x4xf32>, vector<8x4xf32> -> vector<8x4xf32>
    %c0_3 = arith.constant 0 : index
    %c0_4 = arith.constant 0 : index
    %3 = vector.load %arg3[%c0_3, %c0_4] : memref<1x4xf32, #tpu.memory_space<vmem>>, vector<1x4xf32>
    %4 = vector.broadcast %3 : vector<1x4xf32> to vector<8x4xf32>
    %5 = arith.addf %2, %4 : vector<8x4xf32>
    %cst_5 = arith.constant 0.000000e+00 : f32
    %6 = vector.broadcast %cst_5 : f32 to vector<8x4xf32>
    %7 = arith.subf %6, %5 : vector<8x4xf32>
    %8 = math.exp %7 : vector<8x4xf32>
    %cst_6 = arith.constant 1.000000e+00 : f32
    %9 = vector.broadcast %cst_6 : f32 to vector<8x4xf32>
    %10 = arith.addf %9, %8 : vector<8x4xf32>
    %cst_7 = arith.constant 1.000000e+00 : f32
    %11 = vector.broadcast %cst_7 : f32 to vector<8x4xf32>
    %12 = arith.divf %11, %10 : vector<8x4xf32>
    %13 = math.log %12 : vector<8x4xf32>
    %cst_8 = arith.constant -1.000000e+02 : f32
    %14 = vector.broadcast %cst_8 : f32 to vector<8x4xf32>
    %15 = arith.maximumf %13, %14 : vector<8x4xf32>
    %cst_9 = arith.constant 1.000000e+00 : f32
    %16 = vector.broadcast %cst_9 : f32 to vector<8x4xf32>
    %17 = arith.subf %16, %12 : vector<8x4xf32>
    %18 = math.log %17 : vector<8x4xf32>
    %cst_10 = arith.constant -1.000000e+02 : f32
    %19 = vector.broadcast %cst_10 : f32 to vector<8x4xf32>
    %20 = arith.maximumf %18, %19 : vector<8x4xf32>
    %c0_11 = arith.constant 0 : index
    %c0_12 = arith.constant 0 : index
    %21 = vector.load %arg4[%c0_11, %c0_12] : memref<8x4xf32, #tpu.memory_space<vmem>>, vector<8x4xf32>
    %22 = arith.mulf %21, %15 : vector<8x4xf32>
    %cst_13 = arith.constant 1.000000e+00 : f32
    %23 = vector.broadcast %cst_13 : f32 to vector<8x4xf32>
    %24 = arith.subf %23, %21 : vector<8x4xf32>
    %25 = arith.mulf %24, %20 : vector<8x4xf32>
    %26 = arith.addf %22, %25 : vector<8x4xf32>
    %cst_14 = arith.constant 0.000000e+00 : f32
    %27 = vector.broadcast %cst_14 : f32 to vector<8x4xf32>
    %28 = arith.subf %27, %26 : vector<8x4xf32>
    %29 = vector.shape_cast %28 : vector<8x4xf32> to vector<1x8x4xf32>
    %cst_15 = arith.constant dense<0.000000e+00> : vector<1xf32>
    %30 = vector.multi_reduction <add>, %29, %cst_15 [1, 2] : vector<1x8x4xf32> to vector<1xf32>
    %31 = vector.shape_cast %30 : vector<1xf32> to vector<1x1x1xf32>
    %32 = vector.extract %31[0, 0, 0] : f32 from vector<1x1x1xf32>
    %33 = vector.broadcast %32 : f32 to vector<1x8x128xf32>
    %c0_16 = arith.constant 0 : index
    %c0_17 = arith.constant 0 : index
    %c0_18 = arith.constant 0 : index
    %34 = vector.load %arg5[%c0_16, %c0_17, %c0_18] : memref<1x8x128xf32, #tpu.memory_space<vmem>>, vector<1x8x128xf32>
    tpu.vector_store %arg5[%c0_16, %c0_17, %c0_18], %33 {strides = array<i32>} : memref<1x8x128xf32, #tpu.memory_space<vmem>>, vector<1x8x128xf32>,
    return
  }
  func.func @transform_0(%arg0: i32) -> (i32, i32) {
    %c0_i32 = arith.constant 0 : i32
    %c0_i32_0 = arith.constant 0 : i32
    return %arg0, %c0_i32 : i32, i32
  }
  func.func @transform_1(%arg0: i32) -> (i32, i32) {
    %c0_i32 = arith.constant 0 : i32
    %c0_i32_0 = arith.constant 0 : i32
    %c0_i32_1 = arith.constant 0 : i32
    return %c0_i32, %c0_i32_0 : i32, i32
  }
  func.func @transform_2(%arg0: i32) -> (i32, i32) {
    %c0_i32 = arith.constant 0 : i32
    %c0_i32_0 = arith.constant 0 : i32
    %c0_i32_1 = arith.constant 0 : i32
    return %c0_i32, %c0_i32_0 : i32, i32
  }
  func.func @transform_3(%arg0: i32) -> (i32, i32) {
    %c0_i32 = arith.constant 0 : i32
    %c0_i32_0 = arith.constant 0 : i32
    return %arg0, %c0_i32 : i32, i32
  }
  func.func @transform_4(%arg0: i32) -> (i32, i32, i32) {
    %c0_i32 = arith.constant 0 : i32
    %c0_i32_0 = arith.constant 0 : i32
    %c0_i32_1 = arith.constant 0 : i32
    return %arg0, %c0_i32, %c0_i32_0 : i32, i32, i32
  }
}

</mosaic_0001>

<bundles_post_ra>
// kernel: tpu_custom_call.1
= control target key start
LH: loop header
LB: loop body
LE: loop exit
PB: predicated region body
PF: predicated region fallthrough
CT: control target
= control target key end

     0   :  { %v212_v3 = vmov 0.0|0.0   ;;  %vm213_vm0 = vmmov 0   ;;  %v214_v6 = vmov 0.0   ;;  %s274_s0 = inlined_call_operand.vmem [shape: f32[8,32], index: 0, kind: input, shape index: {}]   ;;  %s275_s1 = inlined_call_operand.vmem [shape: f32[32,4], index: 1, kind: input, shape index: {}]   ;;  %s276_s2 = inlined_call_operand.vmem [shape: f32[1,4], index: 2, kind: input, shape index: {}]   ;;  %s277_s3 = inlined_call_operand.vmem [shape: f32[8,4], index: 3, kind: input, shape index: {}]   ;;  %s278_s4 = inlined_call_operand.hbm [shape: f32[1,8,128], index: 4, kind: output, shape index: {}]  }
   0x1   :  { %v19_v0 = vld [vmem:[%s275_s1] sm:$0xff]  ;;  %v20_v1 = vld [vmem:[%s275_s1 + $0x8] sm:$0xff]  ;;  %v21_v2 = vld [vmem:[%s275_s1 + $0x10] sm:$0xff]  ;;  %168 = vmatprep.subr.bf16.mxu0 %v212_v3  ;;  %165 = vmatprep.mubr.msk.f32.mxu0 %vm213_vm0, %v214_v6 }
   0x2   :  { %v169_v4 = vpack.c.bf16 %v20_v1, %v19_v0  ;;  %v22_v5 = vld [vmem:[%s275_s1 + $0x18] sm:$0xff] }
   0x3   :  { %9 = vsyncpa [#allocation3], 0  ;;  %v172_v7 = vpack.c.bf16 %v22_v5, %v21_v2  ;;  %v18_v8 = vld [vmem:[%s274_s0] sm:$0xff]  ;;  %vm30_vm1 = vcmask 261120   ;;  %vm123_vm2 = vcmask 31744  }
   0x4   :  { %170 = vmatpush3.bf16.msra.mxu0 %v169_v4  ;;  %v150_v9 = vld [vmem:[%s276_s2] ss:$0 sm:$0xff]  ;;  %s215_s2 = smov [#allocation2]  }
   0x5   :  { %171 = vmatprep.subr.bf16.mxu0 %v212_v3  ;;  %v117_v20 = vld [vmem:[%s277_s3] sm:$0xff]  ;;  %s142_s3 = sshll.u32 %s215_s2, 4  ;;  %s143_s3 = int_to_ptr.vmem [resolvable:$true] %s142_s3 }
   0x6   :  { %v119_v25 = vsub.f32 1.0, %v117_v20  ;;  %s188_s28 = scalar_lea.vmem %s143_s3, 128  ;;  %p193_p1 = scmp.lt.s32.totalorder %s143_s3, %s143_s3 }
   0x7   :  { %p189_p0 = scmp.ne.s32.totalorder %s143_s3, %s188_s28  ;;  %p194_p2 = scmp.lt.s32.totalorder %s188_s28, %s188_s28 }
   0x8   :  { %173 = vmatpush3.bf16.msra.mxu0 %v172_v7 }
   0x9   :  { %p195_p3 = por %p194_p2, %p193_p1 }
   0xb   :  { %166 = vmatmul.mubr.msk.f32.vlgmr.msra.gmra.mrb[0].mxu0 %vm30_vm1, %v18_v8  ;;  %p196_p4 = pnand %p195_p3, %p189_p0 }
  0xde   :  { %v100_v10 = vpop.f32.mrb[0].mxu0 }
  0xdf   :  { %v101_v11 = vadd.f32 %v150_v9, %v100_v10  ;;  %v167_v12 = vpop.f32.mrb[1].mxu0 }
  0xe1   :  { %v104_v13 = vsub.f32 0.0, %v101_v11 }
  0xe3   :  { %v105_v14 = vmul.f32 1.442695, %v104_v13 }
  0xe5   :  { %180 = vpow2.f32 %v105_v14 }
  0xef   :  { %v181_v15 = vpop.eup %180 }
  0xf0   :  { %v107_v16 = vadd.f32 1.0, %v181_v15 }
  0xf2   :  { %182 = vrcp.f32 %v107_v16 }
  0xfc   :  { %v183_v17 = vpop.eup %182 }
  0xfd   :  { %184 = vlog2.f32 %v183_v17  ;;  %v113_v18 = vsub.f32 1.0, %v183_v17 }
  0xff   :  { %186 = vlog2.f32 %v113_v18 }
 0x107   :  { %v185_v19 = vpop.eup %184 }
 0x108   :  { %v111_v21 = vmul.f32 0.6931472, %v185_v19 }
 0x109   :  { %v187_v22 = vpop.eup %186 }
 0x10a   :  { %v112_v23 = vmax.f32 %v111_v21, -100.0  ;;  %v115_v24 = vmul.f32 0.6931472, %v187_v22 }
 0x10c   :  { %v116_v26 = vmax.f32 %v115_v24, -100.0  ;;  %v118_v27 = vmul.f32 %v117_v20, %v112_v23 }
 0x10e   :  { %v120_v28 = vmul.f32 %v119_v25, %v116_v26 }
 0x110   :  { %v121_v29 = vadd.f32 %v120_v28, %v118_v27 }
 0x112   :  { %v122_v30 = vsub.f32 0.0, %v121_v29 }
 0x114   :  { %v124_v31 = vsel %vm123_vm2, %v122_v30, 0.0 }
 0x115   :  { %125 = vadd.xlane.f32.xlu0 %v124_v31 }
 0x1a2   :  { %v126_v32 = vpop.xlane.xlu0 %125 }
 0x1a3   :  { %v127_v33 = vrot.slane %v126_v32, 4 }
 0x1a5   :  { %v128_v34 = vadd.f32 %v127_v33, %v126_v32 }
 0x1a7   :  { %v129_v35 = vrot.slane %v128_v34, 2 }
 0x1a9   :  { %v130_v36 = vadd.f32 %v129_v35, %v128_v34 }
 0x1ab   :  { %v131_v37 = vrot.slane %v130_v36, 1 }
 0x1ad   :  { %v132_v38 = vadd.f32 %v131_v37, %v130_v36 }
 0x1af   :  { %174 = vpush %v132_v38 }
 0x1e0   :  { %s175_s27 = spop %174 }
 0x1e1   :  { %v134_v39 = vstv %s175_s27 }
 0x1e2   :  { %135 = vst [vmem:[#allocation2] sm:$0xff] %v134_v39 }
 0x1e3   :  { %199 = shalt.err (!%p196_p4)
}
 0x1e4   :  { %s200_s5 = scalar_lea.hbm %s278_s4, 128 }
 0x1e5   :  { %p201_p5 = scmp.ne.s32.totalorder %s278_s4, %s200_s5  ;;  %p204_p6 = scmp.lt.u32.totalorder %s200_s5, %s278_s4 }
 0x1e7   :  { %p206_p7 = pnand %p204_p6, %p201_p5 }
 0x1e9   :  { %209 = shalt.err (!%p206_p7)
}
 0x1ea   :  { %145 = dma.vmem_to_hbm [thread:$0]  %s143_s3, 128, %s278_s4, [#allocation3]  }
 0x1eb   :  { %210 = dma.done.wait [#allocation3], 128  }
 0x1ec   :  { %211 = vsyncadd [#allocation3], 4294967168 }
 0x1ed   :  { %149 = vsyncpa [#allocation3], 1 }

</bundles_post_ra>
